<compile_context>
chip_gen: v7x
topology: tpu7x:2x2x1
jax: 0.10.0
libtpu: 0.0.40
codegen_flags: <defaults>
</compile_context>

<pallas_src>
import jax
import jax.numpy as jnp
from jax.experimental import pallas as pl
from jax.experimental.pallas import tpu as pltpu


def _critic_mlp_kernel(x_ref, w1_ref, b1_ref, w2_ref, b2_ref, o_ref):
    """o = relu(x @ W1 + b1) @ W2 + b2; f32 accumulation, all tiles in VMEM."""
    # In-kernel operand cast: rides VPU slack, avoids an extra HBM pass of x.
    x = x_ref[...].astype(w1_ref.dtype)
    h = jnp.dot(x, w1_ref[...], preferred_element_type=jnp.float32)          # MXU
    h = jnp.maximum(h + b1_ref[...], 0.0)                                     # f32 VPU
    out = jnp.dot(h.astype(w2_ref.dtype), w2_ref[...],
                  preferred_element_type=jnp.float32)                          # MXU
    out = out + b2_ref[...]
    n_out = o_ref.shape[-1]                 # narrow (n_actions-wide) writeback
    o_ref[...] = out[:, :n_out].astype(o_ref.dtype)


def _round_up(n, m):
    return ((n + m - 1) // m) * m


def prepare_critic_params(params, compute_dtype=jnp.bfloat16):
    """One-time device-format prep: zero-pad hidden/output widths to multiples of
    128 lanes; store matmul operands in compute_dtype (bf16 by default; f32 for
    exact PyTorch parity). Biases stay f32."""
    w1, b1, w2, b2 = params
    f_in, hidden = w1.shape
    n_act = w2.shape[1]
    h_pad = _round_up(hidden, 128)
    n_pad = _round_up(n_act, 128)

    w1p = jnp.pad(w1.astype(compute_dtype), ((0, 0), (0, h_pad - hidden)))
    b1p = jnp.pad(b1.astype(jnp.float32), (0, h_pad - hidden)).reshape(1, h_pad)
    w2p = jnp.pad(w2.astype(compute_dtype),
                  ((0, h_pad - hidden), (0, n_pad - n_act)))
    b2p = jnp.pad(b2.astype(jnp.float32), (0, n_pad - n_act)).reshape(1, n_pad)

    return dict(w1=w1p, b1=b1p, w2=w2p, b2=b2p,
                f_in=f_in, n_act=n_act, h_pad=h_pad, n_pad=n_pad)


_GRIDLESS_MAX_B = 256   # up to this many rows: single grid-less call (dispatch bound)
_MAX_TILE_B = 4096      # cap on the derived batch tile (few grid steps, tiny VMEM)


def critic_forward(x, prepared):
    """Critic.forward: flatten to (B, input_shape), run the fused MLP kernel.
    Wrap calls in jax.jit so the (rare) ragged pad and row slice fuse."""
    w1, b1, w2, b2 = prepared["w1"], prepared["b1"], prepared["w2"], prepared["b2"]
    f_in, n_act = prepared["f_in"], prepared["n_act"]
    h_pad, n_pad = prepared["h_pad"], prepared["n_pad"]

    # PyTorch: x.flatten(start_dim=1) if len(x.shape) > 1 else x.flatten()
    squeeze = x.ndim == 1
    x2 = x.reshape(1, -1) if squeeze else x.reshape(x.shape[0], -1)
    b = x2.shape[0]
    assert x2.shape[1] == f_in, (x2.shape, f_in)

    cost = pl.CostEstimate(
        flops=2 * b * (f_in * h_pad + h_pad * n_pad),
        transcendentals=0,
        bytes_accessed=int(x2.size * x2.dtype.itemsize
                           + w1.size * w1.dtype.itemsize
                           + w2.size * w2.dtype.itemsize
                           + b1.size * b1.dtype.itemsize
                           + b2.size * b2.dtype.itemsize
                           + b * n_act * 4),
    )

    if b <= _GRIDLESS_MAX_B:
        # Grid-less call: whole-array VMEM blocks (legal even when not (8,128)
        # aligned). No grid-loop machinery, no batch padding, narrow output.
        out = pl.pallas_call(
            _critic_mlp_kernel,
            out_shape=jax.ShapeDtypeStruct((b, n_act), jnp.float32),
            in_specs=[pl.BlockSpec(memory_space=pltpu.MemorySpace.VMEM)] * 5,
            out_specs=pl.BlockSpec(memory_space=pltpu.MemorySpace.VMEM),
            cost_estimate=cost,
        )(x2, w1, b1, w2, b2)
    else:
        # Derive the batch tile from b: as large as possible (per-grid-step
        # overhead dominates per-tile compute) while keeping >= 2 tiles so the
        # "parallel" axis shards across both v7x TensorCores.
        tile_b = min(_round_up(-(-b // 2), 256), _MAX_TILE_B)
        n_tiles = -(-b // tile_b)
        b_pad = n_tiles * tile_b
        if b_pad != b:
            x2 = jnp.pad(x2, ((0, b_pad - b), (0, 0)))  # fuses under jit
        out = pl.pallas_call(
            _critic_mlp_kernel,
            out_shape=jax.ShapeDtypeStruct((b_pad, n_act), jnp.float32),
            grid=(n_tiles,),
            in_specs=[
                pl.BlockSpec((tile_b, f_in), lambda i: (i, 0)),
                pl.BlockSpec((f_in, h_pad), lambda i: (0, 0)),   # weights stay
                pl.BlockSpec((1, h_pad), lambda i: (0, 0)),      # VMEM-resident
                pl.BlockSpec((h_pad, n_pad), lambda i: (0, 0)),
                pl.BlockSpec((1, n_pad), lambda i: (0, 0)),
            ],
            out_specs=pl.BlockSpec((tile_b, n_act), lambda i: (i, 0)),
            compiler_params=pltpu.CompilerParams(
                dimension_semantics=("parallel",),
            ),
            cost_estimate=cost,
        )(x2, w1, b1, w2, b2)
        out = out[:b]
        # TODO(synk): for very large hidden sizes add hidden-dim (K) tiling with an
        # f32 accumulator scratch + pl.when init/finalize; the switch-over threshold
        # is generation-aware: ~16-24 MiB resident weights on v7x (64 MiB physical /
        # 32 MiB default scoped VMEM) vs roughly double that on v5e/v6e (128 MiB).

    return out[0] if squeeze else out


def init_critic_params(key, input_shape, hidden_layers, n_actions):
    """Deterministic init matching nn.Linear's U(-1/sqrt(fan_in), 1/sqrt(fan_in))."""
    dims = [input_shape] + list(hidden_layers) + [n_actions]
    params = []
    for i in range(len(dims) - 1):
        fan_in, fan_out = dims[i], dims[i + 1]
        key, kw, kb = jax.random.split(key, 3)
        bound = 1.0 / jnp.sqrt(jnp.float32(fan_in))
        w = jax.random.uniform(kw, (fan_in, fan_out), jnp.float32, -bound, bound)
        b = jax.random.uniform(kb, (fan_out,), jnp.float32, -bound, bound)
        params.append((w, b))
    return params


if __name__ == "__main__":
    # Config consistent with the module: input_shape=16, hidden_layers=[64],
    # env.action_space.n=4, batch=2.
    INPUT_SHAPE = 16
    HIDDEN = [64]
    N_ACTIONS = 4
    BATCH = 2

    key = jax.random.PRNGKey(0)
    key, kx = jax.random.split(key)
    x = jax.random.normal(kx, (BATCH, INPUT_SHAPE), dtype=jnp.float32)

    layers = init_critic_params(key, INPUT_SHAPE, HIDDEN, N_ACTIONS)
    (w1, b1), (w2, b2) = layers
    raw_params = (w1, b1, w2, b2)

    # --- exact-semantics f32 path (grid-less, small batch), jitted wrapper ---
    prep_f32 = prepare_critic_params(raw_params, compute_dtype=jnp.float32)
    fwd_f32 = jax.jit(lambda xx: critic_forward(xx, prep_f32))
    out = jax.block_until_ready(fwd_f32(x))
    ref = jnp.maximum(x @ w1 + b1, 0.0) @ w2 + b2
    assert out.shape == (BATCH, N_ACTIONS), out.shape
    assert jnp.allclose(out, ref, atol=1e-5, rtol=1e-5), "f32 mismatch vs reference"

    # --- large-batch path: batch-tiled "parallel" grid + default bf16 operands ---
    BIG_BATCH = 512   # -> tile_b = 256, 2 parallel tiles (uses both v7x TCs)
    xb = jax.random.normal(jax.random.PRNGKey(1), (BIG_BATCH, INPUT_SHAPE),
                           dtype=jnp.float32)
    prep_bf16 = prepare_critic_params(raw_params)  # bf16 default
    fwd_bf16 = jax.jit(lambda xx: critic_forward(xx, prep_bf16))
    outb = jax.block_until_ready(fwd_bf16(xb))
    refb = jnp.maximum(xb @ w1 + b1, 0.0) @ w2 + b2
    assert outb.shape == (BIG_BATCH, N_ACTIONS), outb.shape
    assert jnp.allclose(outb, refb, atol=5e-2, rtol=5e-2), "bf16 mismatch vs reference"

    print("KERNEL_OK")
</pallas_src>

<mosaic_0001>
module attributes {stable_mosaic.version = 11 : i64} {
  func.func @_critic_mlp_kernel(%arg0: memref<2x16xf32, #tpu.memory_space<vmem>>, %arg1: memref<16x128xf32, #tpu.memory_space<vmem>>, %arg2: memref<1x128xf32, #tpu.memory_space<vmem>>, %arg3: memref<128x128xf32, #tpu.memory_space<vmem>>, %arg4: memref<1x128xf32, #tpu.memory_space<vmem>>, %arg5: memref<2x4xf32, #tpu.memory_space<vmem>>) attributes {dimension_semantics = [], scalar_prefetch = 0 : i64, scratch_operands = 0 : i64, tpu.core_type = #tpu.core_type<tc>} {
    %c0 = arith.constant 0 : index
    %c0_0 = arith.constant 0 : index
    %0 = vector.load %arg0[%c0, %c0_0] : memref<2x16xf32, #tpu.memory_space<vmem>>, vector<2x16xf32>
    %c0_1 = arith.constant 0 : index
    %c0_2 = arith.constant 0 : index
    %1 = vector.load %arg1[%c0_1, %c0_2] : memref<16x128xf32, #tpu.memory_space<vmem>>, vector<16x128xf32>
    %cst = arith.constant dense<0.000000e+00> : vector<2x128xf32>
    %2 = tpu.matmul %0, %1, %cst {dimension_numbers = #tpu.dot_dimension_numbers<[1], [0], [0], [1], [0, 0, 1, 1], [], []>} : vector<2x16xf32>, vector<16x128xf32>, vector<2x128xf32> -> vector<2x128xf32>
    %c0_3 = arith.constant 0 : index
    %c0_4 = arith.constant 0 : index
    %3 = vector.load %arg2[%c0_3, %c0_4] : memref<1x128xf32, #tpu.memory_space<vmem>>, vector<1x128xf32>
    %4 = vector.broadcast %3 : vector<1x128xf32> to vector<2x128xf32>
    %5 = arith.addf %2, %4 : vector<2x128xf32>
    %cst_5 = arith.constant 0.000000e+00 : f32
    %6 = vector.broadcast %cst_5 : f32 to vector<2x128xf32>
    %7 = arith.maximumf %5, %6 : vector<2x128xf32>
    %c0_6 = arith.constant 0 : index
    %c0_7 = arith.constant 0 : index
    %8 = vector.load %arg3[%c0_6, %c0_7] : memref<128x128xf32, #tpu.memory_space<vmem>>, vector<128x128xf32>
    %cst_8 = arith.constant dense<0.000000e+00> : vector<2x128xf32>
    %9 = tpu.matmul %7, %8, %cst_8 {dimension_numbers = #tpu.dot_dimension_numbers<[1], [0], [0], [1], [0, 0, 1, 1], [], []>} : vector<2x128xf32>, vector<128x128xf32>, vector<2x128xf32> -> vector<2x128xf32>
    %c0_9 = arith.constant 0 : index
    %c0_10 = arith.constant 0 : index
    %10 = vector.load %arg4[%c0_9, %c0_10] : memref<1x128xf32, #tpu.memory_space<vmem>>, vector<1x128xf32>
    %11 = vector.broadcast %10 : vector<1x128xf32> to vector<2x128xf32>
    %12 = arith.addf %9, %11 : vector<2x128xf32>
    %13 = vector.extract_strided_slice %12 {offsets = [0, 0], sizes = [2, 4], strides = [1, 1]} : vector<2x128xf32> to vector<2x4xf32>
    %c0_11 = arith.constant 0 : index
    %c0_12 = arith.constant 0 : index
    %14 = vector.load %arg5[%c0_11, %c0_12] : memref<2x4xf32, #tpu.memory_space<vmem>>, vector<2x4xf32>
    tpu.vector_store %arg5[%c0_11, %c0_12], %13 {strides = array<i32>} : memref<2x4xf32, #tpu.memory_space<vmem>>, vector<2x4xf32>,
    return
  }
}

</mosaic_0001>

<bundles_post_ra>
// kernel: _lambda_.1
= control target key start
LH: loop header
LB: loop body
LE: loop exit
PB: predicated region body
PF: predicated region fallthrough
CT: control target
= control target key end

     0   :  { %10 = vsyncpa [#allocation3], 0  ;;  %s550_s0 = inlined_call_operand.hbm [shape: f32[2,16], index: 0, kind: input, shape index: {}]   ;;  %s551_s1 = inlined_call_operand.hbm [shape: f32[16,128], index: 1, kind: input, shape index: {}]   ;;  %s552_s2 = inlined_call_operand.vmem [shape: f32[1,128], index: 2, kind: input, shape index: {}]   ;;  %s553_s3 = inlined_call_operand.hbm [shape: f32[128,128], index: 3, kind: input, shape index: {}]   ;;  %s554_s4 = inlined_call_operand.vmem [shape: f32[1,128], index: 4, kind: input, shape index: {}]   ;;  %s555_s5 = inlined_call_operand.hbm [shape: f32[2,4], index: 5, kind: output, shape index: {}]  }
   0x1   :  { %11 = vsyncpa [#allocation6], 0 }
   0x2   :  { %12 = vsyncpa [#allocation4], 0  ;;  %s451_s18 = smov [#allocation5]   ;;  %s357_s22 = scalar_lea.hbm %s551_s1, 256 }
   0x3   :  { %s28_s19 = sshll.u32 %s451_s18, 4  ;;  %p358_p0 = scmp.ne.s32.totalorder %s551_s1, %s357_s22  ;;  %s29_s19 = int_to_ptr.vmem [resolvable:$true] %s28_s19 }
   0x4   :  { %p361_p1 = scmp.lt.u32.totalorder %s357_s22, %s551_s1 }
   0x6   :  { %p363_p2 = pnand %p361_p1, %p358_p0 }
   0x8   :  { %366 = shalt.err (!%p363_p2)
}
   0x9   :  { %s367_s27 = scalar_lea.vmem %s29_s19, 256  ;;  %p372_p4 = scmp.lt.s32.totalorder %s29_s19, %s29_s19 }
   0xa   :  { %p368_p3 = scmp.ne.s32.totalorder %s29_s19, %s367_s27  ;;  %p373_p5 = scmp.lt.s32.totalorder %s367_s27, %s367_s27 }
   0xc   :  { %p374_p6 = por %p373_p5, %p372_p4 }
   0xe   :  { %p375_p7 = pnand %p374_p6, %p368_p3 }
  0x10   :  { %378 = shalt.err (!%p375_p7)
}
  0x11   :  { %s452_s28 = smov 128   ;;  %s453_s29 = smov 8  }
  0x12   :  { %34 = dma.hbm_to_vmem [thread:$0]  %s551_s1, 256, %s29_s19, [#allocation6], %s452_s28, %s452_s28, %s453_s29  }
  0x13   :  { %s454_s7 = smov [#allocation2]   ;;  %s455_s9 = smov [#allocation7]  }
  0x14   :  { %s19_s8 = sshll.u32 %s454_s7, 4  ;;  %s42_s10 = sshll.u32 %s455_s9, 4  ;;  %s20_s8 = int_to_ptr.vmem [resolvable:$true] %s19_s8  ;;  %s43_s10 = int_to_ptr.vmem [resolvable:$true] %s42_s10 }
  0x15   :  { %s379_s13 = scalar_lea.hbm %s550_s0, 32 }
  0x16   :  { %p380_p8 = scmp.ne.s32.totalorder %s550_s0, %s379_s13  ;;  %p383_p9 = scmp.lt.u32.totalorder %s379_s13, %s550_s0 }
  0x18   :  { %p385_p10 = pnand %p383_p9, %p380_p8 }
  0x1a   :  { %388 = shalt.err (!%p385_p10)
}
  0x1b   :  { %s389_s1 = scalar_lea.vmem %s20_s8, 32  ;;  %p394_p12 = scmp.lt.s32.totalorder %s20_s8, %s20_s8 }
  0x1c   :  { %p390_p11 = scmp.ne.s32.totalorder %s20_s8, %s389_s1  ;;  %p395_p13 = scmp.lt.s32.totalorder %s389_s1, %s389_s1 }
  0x1e   :  { %p396_p0 = por %p395_p13, %p394_p12 }
  0x20   :  { %p397_p1 = pnand %p396_p0, %p390_p11 }
  0x22   :  { %400 = shalt.err (!%p397_p1)
}
  0x23   :  { %22 = dma.hbm_to_vmem [thread:$0]  %s550_s0, 32, %s20_s8, [#allocation3]  }
  0x24   :  { %s401_s22 = scalar_lea.hbm %s553_s3, 2048 }
  0x25   :  { %p402_p2 = scmp.ne.s32.totalorder %s553_s3, %s401_s22  ;;  %p405_p3 = scmp.lt.u32.totalorder %s401_s22, %s553_s3 }
  0x27   :  { %p407_p4 = pnand %p405_p3, %p402_p2 }
  0x29   :  { %410 = shalt.err (!%p407_p4)
}
  0x2a   :  { %s411_s27 = scalar_lea.vmem %s43_s10, 2048  ;;  %p416_p6 = scmp.lt.s32.totalorder %s43_s10, %s43_s10 }
  0x2b   :  { %p412_p5 = scmp.ne.s32.totalorder %s43_s10, %s411_s27  ;;  %p417_p7 = scmp.lt.s32.totalorder %s411_s27, %s411_s27 }
  0x2d   :  { %p418_p8 = por %p417_p7, %p416_p6 }
  0x2f   :  { %p419_p9 = pnand %p418_p8, %p412_p5 }
  0x31   :  { %422 = shalt.err (!%p419_p9)
}
  0x32   :  { %48 = dma.hbm_to_vmem [thread:$0]  %s553_s3, 2048, %s43_s10, [#allocation6], %s452_s28, %s452_s28, %s453_s29  }
  0x33   :  { %445 = dma.done.wait [#allocation3], 32  }
  0x34   :  { %446 = vsyncadd [#allocation3], 4294967264 }
  0x35   :  { %447 = dma.done.wait [#allocation6], 2304  }
  0x36   :  { %448 = vsyncadd [#allocation6], 4294964992  ;;  %v456_v0 = vmov 0.0|0.0   ;;  %vm457_vm0 = vmmov 0   ;;  %v458_v1 = vmov 0.0   ;;  %v61_v2 = vld [vmem:[#allocation5] sm:$0xff] }
  0x37   :  { %321 = vmatprep.subr.bf16.mxu0 %v456_v0  ;;  %283 = vmatprep.mubr.msk.f32.mxu0 %vm457_vm0, %v458_v1  ;;  %v62_v3 = vld [vmem:[#allocation5 + $0x8] sm:$0xff]  ;;  %v145_v5 = vld [vmem:[#allocation7] sm:$0xff]  ;;  %v146_v6 = vld [vmem:[#allocation7 + $0x8] sm:$0xff]  ;;  %vm70_vm1 = vcmask 130048   ;;  %s459_s7 = smov [#allocation8]   ;;  %vm238_vm2 = vcmask 25600  }
  0x38   :  { %324 = vmatprep.subr.bf16.mxu1 %v456_v0  ;;  %318 = vmatprep.mubr.msk.f32.mxu1 %vm457_vm0, %v458_v1  ;;  %v322_v4 = vpack.c.bf16 %v62_v3, %v61_v2  ;;  %v147_v7 = vld [vmem:[#allocation7 + $0x10] sm:$0xff]  ;;  %v325_v8 = vpack.c.bf16 %v146_v6, %v145_v5  ;;  %v148_v9 = vld [vmem:[#allocation7 + $0x18] sm:$0xff]  ;;  %v60_v10 = vld [vmem:[#allocation2] sm:$0x3]  ;;  %s246_s8 = sshll.u32 %s459_s7, 4  ;;  %s247_s8 = int_to_ptr.vmem [resolvable:$true] %s246_s8 }
  0x39   :  { %v328_v11 = vpack.c.bf16 %v148_v9, %v147_v7  ;;  %v149_v12 = vld [vmem:[#allocation7 + $0x20] sm:$0xff]  ;;  %v150_v13 = vld [vmem:[#allocation7 + $0x28] sm:$0xff]  ;;  %v151_v15 = vld [vmem:[#allocation7 + $0x30] sm:$0xff]  ;;  %s423_s9 = scalar_lea.vmem %s247_s8, 32  ;;  %p428_p11 = scmp.lt.s32.totalorder %s247_s8, %s247_s8 }
  0x3a   :  { %323 = vmatpush3.bf16.msra.mxu0 %v322_v4  ;;  %326 = vmatpush3.bf16.msra.mxu1 %v325_v8  ;;  %v331_v14 = vpack.c.bf16 %v150_v13, %v149_v12  ;;  %v152_v16 = vld [vmem:[#allocation7 + $0x38] sm:$0xff]  ;;  %v153_v18 = vld [vmem:[#allocation7 + $0x40] sm:$0xff]  ;;  %v154_v19 = vld [vmem:[#allocation7 + $0x48] sm:$0xff]  ;;  %p424_p10 = scmp.ne.s32.totalorder %s247_s8, %s423_s9  ;;  %p429_p12 = scmp.lt.s32.totalorder %s423_s9, %s423_s9 }
  0x3b   :  { %327 = vmatprep.subr.bf16.mxu1 %v456_v0  ;;  %v334_v17 = vpack.c.bf16 %v152_v16, %v151_v15  ;;  %v337_v20 = vpack.c.bf16 %v154_v19, %v153_v18  ;;  %v155_v21 = vld [vmem:[#allocation7 + $0x50] sm:$0xff]  ;;  %v156_v22 = vld [vmem:[#allocation7 + $0x58] sm:$0xff]  ;;  %v157_v24 = vld [vmem:[#allocation7 + $0x60] sm:$0xff] }
  0x3c   :  { %v340_v23 = vpack.c.bf16 %v156_v22, %v155_v21  ;;  %v158_v25 = vld [vmem:[#allocation7 + $0x68] sm:$0xff]  ;;  %v159_v27 = vld [vmem:[#allocation7 + $0x70] sm:$0xff]  ;;  %v160_v28 = vld [vmem:[#allocation7 + $0x78] sm:$0xff]  ;;  %p430_p13 = por %p429_p12, %p428_p11 }
  0x3d   :  { %284 = vmatmul.mubr.msk.f32.vlgmr.msra.gmra.mrb[0].mxu0 %vm70_vm1, %v60_v10  ;;  %v343_v26 = vpack.c.bf16 %v158_v25, %v157_v24  ;;  %v346_v29 = vpack.c.bf16 %v160_v28, %v159_v27  ;;  %v256_v30 = vld [vmem:[%s552_s2] ss:$0 sm:$0xff] }
  0x3e   :  { %329 = vmatpush3.bf16.msra.mxu1 %v328_v11  ;;  %v258_v35 = vld [vmem:[%s554_s4] ss:$0 sm:$0xff]  ;;  %p431_p0 = pnand %p430_p13, %p424_p10 }
  0x3f   :  { %330 = vmatprep.subr.bf16.mxu1 %v456_v0 }
  0x42   :  { %332 = vmatpush3.bf16.msra.mxu1 %v331_v14 }
  0x43   :  { %333 = vmatprep.subr.bf16.mxu1 %v456_v0 }
  0x46   :  { %335 = vmatpush3.bf16.msra.mxu1 %v334_v17 }
  0x47   :  { %336 = vmatprep.subr.bf16.mxu1 %v456_v0 }
  0x4a   :  { %338 = vmatpush3.bf16.msra.mxu1 %v337_v20 }
  0x4b   :  { %339 = vmatprep.subr.bf16.mxu1 %v456_v0 }
  0x4e   :  { %341 = vmatpush3.bf16.msra.mxu1 %v340_v23 }
  0x4f   :  { %342 = vmatprep.subr.bf16.mxu1 %v456_v0 }
  0x52   :  { %344 = vmatpush3.bf16.msra.mxu1 %v343_v26 }
  0x53   :  { %345 = vmatprep.subr.bf16.mxu1 %v456_v0 }
  0x56   :  { %347 = vmatpush3.bf16.msra.mxu1 %v346_v29 }
 0x110   :  { %v140_v31 = vpop.f32.mrb[0].mxu0 }
 0x111   :  { %v141_v32 = vadd.f32 %v256_v30, %v140_v31  ;;  %v285_v33 = vpop.f32.mrb[1].mxu0 }
 0x113   :  { %v144_v34 = vmax.f32 %v141_v32, 0.0 }
 0x115   :  { %319 = vmatmul.mubr.f32.vlgmr.msra.gmra.mrb[0].mxu1 %v144_v34 }
 0x1e8   :  { %v234_v36 = vpop.f32.mrb[0].mxu1 }
 0x1e9   :  { %v235_v37 = vadd.f32 %v258_v35, %v234_v36  ;;  %v320_v38 = vpop.f32.mrb[1].mxu1 }
 0x1eb   :  { %239 = vst.msk [vmem:[#allocation8] sm:$0x3] %vm238_vm2, %v235_v37 }
 0x1ec   :  { %434 = shalt.err (!%p431_p0)
}
 0x1ed   :  { %s435_s11 = scalar_lea.hbm %s555_s5, 32 }
 0x1ee   :  { %p436_p1 = scmp.ne.s32.totalorder %s555_s5, %s435_s11  ;;  %p439_p2 = scmp.lt.u32.totalorder %s435_s11, %s555_s5 }
 0x1f0   :  { %p441_p3 = pnand %p439_p2, %p436_p1 }
 0x1f2   :  { %444 = shalt.err (!%p441_p3)
}
 0x1f3   :  { %249 = dma.vmem_to_hbm [thread:$0]  %s247_s8, 32, %s555_s5, [#allocation4]  }
 0x1f4   :  { %449 = dma.done.wait [#allocation4], 32  }
 0x1f5   :  { %450 = vsyncadd [#allocation4], 4294967264 }
 0x1f6   :  { %253 = vsyncpa [#allocation3], 1 }
 0x1f7   :  { %254 = vsyncpa [#allocation6], 1 }
 0x1f8   :  { %255 = vsyncpa [#allocation4], 1 }

</bundles_post_ra>
